<compile_context>
chip_gen: v6e
topology: v6e:2x2x1
jax: 0.10.0
libtpu: 0.0.40
codegen_flags: <defaults>
</compile_context>

<pallas_src>
import functools

import jax
import jax.numpy as jnp
from jax import lax
from jax.experimental import pallas as pl
from jax.experimental.pallas import tpu as pltpu

ALPHA = 0.2
SIGMA_REC = 0.15
INPUT_SIZE = 6
OUTPUT_SIZE = 2


def _round_up(x, m):
    return (x + m - 1) // m * m


def _rnn_kernel(u_ref, noise_ref, wrec_ref, win_ref, states_ref,
                s_ref, pre_ref, *, alpha, unroll):
    """One (batch tile, time chunk) of the recurrence.

    u_ref:      (TC, Bt, K)   f32  inputs for this chunk (time-major)
    noise_ref:  (TC, Bt, Np)  f32  pre-scaled noise for this chunk
    wrec_ref:   (Np, Np)      f32  = W_rec^T (zero-padded)
    win_ref:    (K,  Np)      f32  = W_in^T  (zero-padded)
    states_ref: (TC, Bt, Np)  f32  output states for this chunk
    s_ref:      (Bt, Np)      f32  scratch: state carried across time chunks
    pre_ref:    (TC, Bt, Np)  f32  scratch: hoisted input projection
    """
    t_chunk = states_ref.shape[0]

    # First time chunk of each batch tile: reset the carried state to zero.
    @pl.when(pl.program_id(1) == 0)
    def _():
        s_ref[...] = jnp.zeros_like(s_ref)

    # Hoisted input projection for the whole chunk: one batched MXU matmul,
    # fully parallel over time, removed from the serial dependency chain.
    pre_ref[...] = (
        jnp.einsum("tbk,kn->tbn", u_ref[...], win_ref[...],
                   preferred_element_type=jnp.float32)
        + noise_ref[...]
    )

    w_rec = wrec_ref[...]   # load recurrent weights once (vreg-resident for Np=128)
    one_minus_alpha = 1.0 - alpha

    def step(j, s):
        # states[t] is written before states[t+1] is computed, so the last
        # timestep's u/noise is (correctly) never consumed.
        states_ref[j] = s
        pre = jnp.dot(s, w_rec, preferred_element_type=jnp.float32) + pre_ref[j]
        return one_minus_alpha * s + alpha * jnp.maximum(pre, 0.0)

    # State lives in vregs inside the chunk; written back once per chunk.
    s_ref[...] = lax.fori_loop(0, t_chunk, step, s_ref[...], unroll=unroll)


@jax.jit
def rnn_forward(u, noise, w_rec, w_in, w_out, mask):
    """u: (B, T, 6); noise: (B, T, N) already scaled by sqrt(2*alpha*sigma^2);
    weights in PyTorch nn.Linear convention: w_rec (N,N), w_in (N,6), w_out (2,N).
    Returns (states, output[:, mask, :], output) like the torch module."""
    B, T, K = u.shape
    N = w_rec.shape[0]
    f32 = jnp.float32

    # Lane/sublane-dense padding.
    b_pad = _round_up(B, 8)
    n_pad = _round_up(N, 128)
    b_tile = min(b_pad, 128)
    b_pad = _round_up(b_pad, b_tile)
    t_chunk = T if T <= 64 else 64
    t_pad = _round_up(T, t_chunk)

    # Time-major, zero-padded activations.
    u_t = jnp.zeros((t_pad, b_pad, K), f32).at[:T, :B, :].set(
        jnp.transpose(u, (1, 0, 2)).astype(f32))
    noise_t = jnp.zeros((t_pad, b_pad, n_pad), f32).at[:T, :B, :N].set(
        jnp.transpose(noise, (1, 0, 2)).astype(f32))

    # Weights pre-transposed to (fan_in, fan_out) and zero-padded so padded
    # state lanes stay exactly zero through ReLU and the leaky blend.
    wrec_p = jnp.zeros((n_pad, n_pad), f32).at[:N, :N].set(w_rec.T.astype(f32))
    win_p = jnp.zeros((K, n_pad), f32).at[:, :N].set(w_in.T.astype(f32))
    # TODO(synk): for large N on v5e/v6e, cast wrec_p/win_p (and the dot inputs)
    # to bfloat16 with f32 accumulation for ~3x MXU throughput.

    grid = (b_pad // b_tile, t_pad // t_chunk)
    unroll = min(t_chunk, 8)
    kernel = functools.partial(_rnn_kernel, alpha=ALPHA, unroll=unroll)

    states_t = pl.pallas_call(
        kernel,
        out_shape=jax.ShapeDtypeStruct((t_pad, b_pad, n_pad), f32),
        grid_spec=pltpu.PrefetchScalarGridSpec(
            num_scalar_prefetch=0,
            grid=grid,
            in_specs=[
                pl.BlockSpec((t_chunk, b_tile, K), lambda b, c: (c, b, 0)),
                pl.BlockSpec((t_chunk, b_tile, n_pad), lambda b, c: (c, b, 0)),
                pl.BlockSpec((n_pad, n_pad), lambda b, c: (0, 0)),
                pl.BlockSpec((K, n_pad), lambda b, c: (0, 0)),
            ],
            out_specs=pl.BlockSpec((t_chunk, b_tile, n_pad),
                                   lambda b, c: (c, b, 0)),
            scratch_shapes=[
                pltpu.VMEM((b_tile, n_pad), f32),            # carried state
                pltpu.VMEM((t_chunk, b_tile, n_pad), f32),   # hoisted input proj
            ],
        ),
        compiler_params=pltpu.CompilerParams(
            dimension_semantics=("parallel", "arbitrary"),
        ),
    )(u_t, noise_t, wrec_p, win_p)

    # Un-pad and restore the PyTorch (B, T, N) layout. One fused slice+transpose
    # in XLA; a copy is unavoidable anyway because of the padding.
    states = jnp.transpose(states_t[:T, :B, :N], (1, 0, 2))

    # Lane-dense output projection (last dim = 2) done by XLA: it is fully
    # parallel and not part of the sequential recurrence.
    output = states @ w_out.T.astype(f32)              # (B, T, 2)
    return states, output[:, mask, :], output


if __name__ == "__main__":
    # Small shapes consistent with the forward pass.
    B, T, N = 2, 8, 32

    key = jax.random.PRNGKey(0)
    k_u, k_noise, k_rec, k_in, k_out = jax.random.split(key, 5)

    # nn.Linear-style uniform init.
    # TODO(synk): small_connectivity / large_connectivity masks are not defined
    # in the reference; unmasked weights are used.
    w_rec = jax.random.uniform(k_rec, (N, N), jnp.float32,
                               -1.0 / jnp.sqrt(N), 1.0 / jnp.sqrt(N))
    w_in = jax.random.uniform(k_in, (N, INPUT_SIZE), jnp.float32,
                              -1.0 / jnp.sqrt(INPUT_SIZE),
                              1.0 / jnp.sqrt(INPUT_SIZE))
    w_out = jax.random.uniform(k_out, (OUTPUT_SIZE, N), jnp.float32,
                               -1.0 / jnp.sqrt(N), 1.0 / jnp.sqrt(N))

    u = jax.random.normal(k_u, (B, T, INPUT_SIZE), jnp.float32)

    # noise = sqrt(2*alpha*sigma_rec^2) * N(0,1), drawn deterministically here
    # (the torch module samples it inside forward()).
    noise_scale = jnp.sqrt(2.0 * ALPHA * SIGMA_REC ** 2)
    noise = noise_scale * jax.random.normal(k_noise, (B, T, N), jnp.float32)

    mask = jnp.array([1, 3, 5, 7], dtype=jnp.int32)   # time-index mask

    states, masked_output, output = rnn_forward(u, noise, w_rec, w_in, w_out, mask)
    jax.block_until_ready((states, masked_output, output))

    # Pure-JAX reference of the recurrence.
    def ref_forward(u, noise, w_rec, w_in, w_out, mask):
        s = jnp.zeros((B, N), jnp.float32)
        sts = [s]
        for i in range(T - 1):
            pre = s @ w_rec.T + u[:, i, :] @ w_in.T + noise[:, i, :]
            s = (1.0 - ALPHA) * s + ALPHA * jnp.maximum(pre, 0.0)
            sts.append(s)
        st = jnp.stack(sts, axis=1)
        out = st @ w_out.T
        return st, out[:, mask, :], out

    ref_states, ref_masked, ref_output = ref_forward(u, noise, w_rec, w_in,
                                                     w_out, mask)
    assert jnp.allclose(states, ref_states, atol=1e-5, rtol=1e-5)
    assert jnp.allclose(output, ref_output, atol=1e-5, rtol=1e-5)
    assert jnp.allclose(masked_output, ref_masked, atol=1e-5, rtol=1e-5)

    print("KERNEL_OK")
</pallas_src>

<mosaic_0001>
module attributes {stable_mosaic.version = 11 : i64} {
  func.func @_rnn_kernel(%arg0: i32, %arg1: i32, %arg2: memref<8x8x6xf32, #tpu.memory_space<vmem>>, %arg3: memref<8x8x128xf32, #tpu.memory_space<vmem>>, %arg4: memref<128x128xf32, #tpu.memory_space<vmem>>, %arg5: memref<6x128xf32, #tpu.memory_space<vmem>>, %arg6: memref<8x8x128xf32, #tpu.memory_space<vmem>>, %arg7: memref<8x128xf32, #tpu.memory_space<vmem>>, %arg8: memref<8x8x128xf32, #tpu.memory_space<vmem>>) attributes {dimension_semantics = [#tpu.dimension_semantics<parallel>, #tpu.dimension_semantics<arbitrary>], iteration_bounds = array<i64: 1, 1>, scalar_prefetch = 0 : i64, scratch_operands = 2 : i64, tpu.core_type = #tpu.core_type<tc>, window_params = [{transform_indices = @transform_0, window_bounds = array<i64: 8, 8, 6>}, {transform_indices = @transform_1, window_bounds = array<i64: 8, 8, 128>}, {pipeline_mode = #tpu.pipeline_mode<synchronous>, transform_indices = @transform_2, window_bounds = array<i64: 128, 128>}, {pipeline_mode = #tpu.pipeline_mode<synchronous>, transform_indices = @transform_3, window_bounds = array<i64: 6, 128>}, {transform_indices = @transform_4, window_bounds = array<i64: 8, 8, 128>}]} {
    %c0_i32 = arith.constant 0 : i32
    %0 = arith.cmpi eq, %arg1, %c0_i32 : i32
    %1 = arith.extui %0 : i1 to i32
    %c0_i32_0 = arith.constant 0 : i32
    %2 = arith.cmpi ne, %1, %c0_i32_0 : i32
    scf.if %2 {
      %cst_82 = arith.constant 0.000000e+00 : f32
      %140 = vector.broadcast %cst_82 : f32 to vector<8x128xf32>
      %c0_83 = arith.constant 0 : index
      %c0_84 = arith.constant 0 : index
      %141 = vector.load %arg7[%c0_83, %c0_84] : memref<8x128xf32, #tpu.memory_space<vmem>>, vector<8x128xf32>
      tpu.vector_store %arg7[%c0_83, %c0_84], %140 {strides = array<i32>} : memref<8x128xf32, #tpu.memory_space<vmem>>, vector<8x128xf32>,
    } else {
    }
    %c0 = arith.constant 0 : index
    %c0_1 = arith.constant 0 : index
    %c0_2 = arith.constant 0 : index
    %3 = vector.load %arg2[%c0, %c0_1, %c0_2] : memref<8x8x6xf32, #tpu.memory_space<vmem>>, vector<8x8x6xf32>
    %c0_3 = arith.constant 0 : index
    %c0_4 = arith.constant 0 : index
    %4 = vector.load %arg5[%c0_3, %c0_4] : memref<6x128xf32, #tpu.memory_space<vmem>>, vector<6x128xf32>
    "tpu.trace_start"() <{level = 10 : i32, message = "tbk,kn->tbn"}> : () -> ()
    %cst = arith.constant dense<0.000000e+00> : vector<8x8x128xf32>
    %5 = tpu.matmul %3, %4, %cst {dimension_numbers = #tpu.dot_dimension_numbers<[2], [0], [0, 1], [1], [0, 0, 0, 1, 1, 1], [], []>} : vector<8x8x6xf32>, vector<6x128xf32>, vector<8x8x128xf32> -> vector<8x8x128xf32>
    "tpu.trace_stop"() : () -> ()
    %c0_5 = arith.constant 0 : index
    %c0_6 = arith.constant 0 : index
    %c0_7 = arith.constant 0 : index
    %6 = vector.load %arg3[%c0_5, %c0_6, %c0_7] : memref<8x8x128xf32, #tpu.memory_space<vmem>>, vector<8x8x128xf32>
    %7 = arith.addf %5, %6 : vector<8x8x128xf32>
    %c0_8 = arith.constant 0 : index
    %c0_9 = arith.constant 0 : index
    %c0_10 = arith.constant 0 : index
    %8 = vector.load %arg8[%c0_8, %c0_9, %c0_10] : memref<8x8x128xf32, #tpu.memory_space<vmem>>, vector<8x8x128xf32>
    tpu.vector_store %arg8[%c0_8, %c0_9, %c0_10], %7 {strides = array<i32>} : memref<8x8x128xf32, #tpu.memory_space<vmem>>, vector<8x8x128xf32>,
    %c0_11 = arith.constant 0 : index
    %c0_12 = arith.constant 0 : index
    %9 = vector.load %arg4[%c0_11, %c0_12] : memref<128x128xf32, #tpu.memory_space<vmem>>, vector<128x128xf32>
    %c0_13 = arith.constant 0 : index
    %c0_14 = arith.constant 0 : index
    %10 = vector.load %arg7[%c0_13, %c0_14] : memref<8x128xf32, #tpu.memory_space<vmem>>, vector<8x128xf32>
    %c0_i32_15 = arith.constant 0 : i32
    %11 = arith.index_cast %c0_i32_15 : i32 to index
    %c0_16 = arith.constant 0 : index
    %c0_17 = arith.constant 0 : index
    %12 = vector.load %arg6[%11, %c0_16, %c0_17] : memref<8x8x128xf32, #tpu.memory_space<vmem>>, vector<1x8x128xf32>
    %13 = vector.shape_cast %12 : vector<1x8x128xf32> to vector<8x128xf32>
    %14 = vector.shape_cast %10 : vector<8x128xf32> to vector<1x8x128xf32>
    tpu.vector_store %arg6[%11, %c0_16, %c0_17], %14 {strides = array<i32>} : memref<8x8x128xf32, #tpu.memory_space<vmem>>, vector<1x8x128xf32>,
    %cst_18 = arith.constant dense<0.000000e+00> : vector<8x128xf32>
    %15 = tpu.matmul %10, %9, %cst_18 {dimension_numbers = #tpu.dot_dimension_numbers<[1], [0], [0], [1], [0, 0, 1, 1], [], []>} : vector<8x128xf32>, vector<128x128xf32>, vector<8x128xf32> -> vector<8x128xf32>
    %16 = arith.index_cast %c0_i32_15 : i32 to index
    %c0_19 = arith.constant 0 : index
    %c0_20 = arith.constant 0 : index
    %17 = vector.load %arg8[%16, %c0_19, %c0_20] : memref<8x8x128xf32, #tpu.memory_space<vmem>>, vector<1x8x128xf32>
    %18 = vector.shape_cast %17 : vector<1x8x128xf32> to vector<8x128xf32>
    %19 = arith.addf %15, %18 : vector<8x128xf32>
    %cst_21 = arith.constant 8.000000e-01 : f32
    %20 = vector.broadcast %cst_21 : f32 to vector<8x128xf32>
    %21 = arith.mulf %20, %10 : vector<8x128xf32>
    %cst_22 = arith.constant 0.000000e+00 : f32
    %22 = vector.broadcast %cst_22 : f32 to vector<8x128xf32>
    %23 = arith.maximumf %19, %22 : vector<8x128xf32>
    %cst_23 = arith.constant 2.000000e-01 : f32
    %24 = vector.broadcast %cst_23 : f32 to vector<8x128xf32>
    %25 = arith.mulf %24, %23 : vector<8x128xf32>
    %26 = arith.addf %21, %25 : vector<8x128xf32>
    %c1_i32 = arith.constant 1 : i32
    %27 = arith.index_cast %c1_i32 : i32 to index
    %c0_24 = arith.constant 0 : index
    %c0_25 = arith.constant 0 : index
    %28 = vector.load %arg6[%27, %c0_24, %c0_25] : memref<8x8x128xf32, #tpu.memory_space<vmem>>, vector<1x8x128xf32>
    %29 = vector.shape_cast %28 : vector<1x8x128xf32> to vector<8x128xf32>
    %30 = vector.shape_cast %26 : vector<8x128xf32> to vector<1x8x128xf32>
    tpu.vector_store %arg6[%27, %c0_24, %c0_25], %30 {strides = array<i32>} : memref<8x8x128xf32, #tpu.memory_space<vmem>>, vector<1x8x128xf32>,
    %cst_26 = arith.constant dense<0.000000e+00> : vector<8x128xf32>
    %31 = tpu.matmul %26, %9, %cst_26 {dimension_numbers = #tpu.dot_dimension_numbers<[1], [0], [0], [1], [0, 0, 1, 1], [], []>} : vector<8x128xf32>, vector<128x128xf32>, vector<8x128xf32> -> vector<8x128xf32>
    %32 = arith.index_cast %c1_i32 : i32 to index
    %c0_27 = arith.constant 0 : index
    %c0_28 = arith.constant 0 : index
    %33 = vector.load %arg8[%32, %c0_27, %c0_28] : memref<8x8x128xf32, #tpu.memory_space<vmem>>, vector<1x8x128xf32>
    %34 = vector.shape_cast %33 : vector<1x8x128xf32> to vector<8x128xf32>
    %35 = arith.addf %31, %34 : vector<8x128xf32>
    %cst_29 = arith.constant 8.000000e-01 : f32
    %36 = vector.broadcast %cst_29 : f32 to vector<8x128xf32>
    %37 = arith.mulf %36, %26 : vector<8x128xf32>
    %cst_30 = arith.constant 0.000000e+00 : f32
    %38 = vector.broadcast %cst_30 : f32 to vector<8x128xf32>
    %39 = arith.maximumf %35, %38 : vector<8x128xf32>
    %cst_31 = arith.constant 2.000000e-01 : f32
    %40 = vector.broadcast %cst_31 : f32 to vector<8x128xf32>
    %41 = arith.mulf %40, %39 : vector<8x128xf32>
    %42 = arith.addf %37, %41 : vector<8x128xf32>
    %c2_i32 = arith.constant 2 : i32
    %43 = arith.index_cast %c2_i32 : i32 to index
    %c0_32 = arith.constant 0 : index
    %c0_33 = arith.constant 0 : index
    %44 = vector.load %arg6[%43, %c0_32, %c0_33] : memref<8x8x128xf32, #tpu.memory_space<vmem>>, vector<1x8x128xf32>
    %45 = vector.shape_cast %44 : vector<1x8x128xf32> to vector<8x128xf32>
    %46 = vector.shape_cast %42 : vector<8x128xf32> to vector<1x8x128xf32>
    tpu.vector_store %arg6[%43, %c0_32, %c0_33], %46 {strides = array<i32>} : memref<8x8x128xf32, #tpu.memory_space<vmem>>, vector<1x8x128xf32>,
    %cst_34 = arith.constant dense<0.000000e+00> : vector<8x128xf32>
    %47 = tpu.matmul %42, %9, %cst_34 {dimension_numbers = #tpu.dot_dimension_numbers<[1], [0], [0], [1], [0, 0, 1, 1], [], []>} : vector<8x128xf32>, vector<128x128xf32>, vector<8x128xf32> -> vector<8x128xf32>
    %48 = arith.index_cast %c2_i32 : i32 to index
    %c0_35 = arith.constant 0 : index
    %c0_36 = arith.constant 0 : index
    %49 = vector.load %arg8[%48, %c0_35, %c0_36] : memref<8x8x128xf32, #tpu.memory_space<vmem>>, vector<1x8x128xf32>
    %50 = vector.shape_cast %49 : vector<1x8x128xf32> to vector<8x128xf32>
    %51 = arith.addf %47, %50 : vector<8x128xf32>
    %cst_37 = arith.constant 8.000000e-01 : f32
    %52 = vector.broadcast %cst_37 : f32 to vector<8x128xf32>
    %53 = arith.mulf %52, %42 : vector<8x128xf32>
    %cst_38 = arith.constant 0.000000e+00 : f32
    %54 = vector.broadcast %cst_38 : f32 to vector<8x128xf32>
    %55 = arith.maximumf %51, %54 : vector<8x128xf32>
    %cst_39 = arith.constant 2.000000e-01 : f32
    %56 = vector.broadcast %cst_39 : f32 to vector<8x128xf32>
    %57 = arith.mulf %56, %55 : vector<8x128xf32>
    %58 = arith.addf %53, %57 : vector<8x128xf32>
    %c3_i32 = arith.constant 3 : i32
    %59 = arith.index_cast %c3_i32 : i32 to index
    %c0_40 = arith.constant 0 : index
    %c0_41 = arith.constant 0 : index
    %60 = vector.load %arg6[%59, %c0_40, %c0_41] : memref<8x8x128xf32, #tpu.memory_space<vmem>>, vector<1x8x128xf32>
    %61 = vector.shape_cast %60 : vector<1x8x128xf32> to vector<8x128xf32>
    %62 = vector.shape_cast %58 : vector<8x128xf32> to vector<1x8x128xf32>
    tpu.vector_store %arg6[%59, %c0_40, %c0_41], %62 {strides = array<i32>} : memref<8x8x128xf32, #tpu.memory_space<vmem>>, vector<1x8x128xf32>,
    %cst_42 = arith.constant dense<0.000000e+00> : vector<8x128xf32>
    %63 = tpu.matmul %58, %9, %cst_42 {dimension_numbers = #tpu.dot_dimension_numbers<[1], [0], [0], [1], [0, 0, 1, 1], [], []>} : vector<8x128xf32>, vector<128x128xf32>, vector<8x128xf32> -> vector<8x128xf32>
    %64 = arith.index_cast %c3_i32 : i32 to index
    %c0_43 = arith.constant 0 : index
    %c0_44 = arith.constant 0 : index
    %65 = vector.load %arg8[%64, %c0_43, %c0_44] : memref<8x8x128xf32, #tpu.memory_space<vmem>>, vector<1x8x128xf32>
    %66 = vector.shape_cast %65 : vector<1x8x128xf32> to vector<8x128xf32>
    %67 = arith.addf %63, %66 : vector<8x128xf32>
    %cst_45 = arith.constant 8.000000e-01 : f32
    %68 = vector.broadcast %cst_45 : f32 to vector<8x128xf32>
    %69 = arith.mulf %68, %58 : vector<8x128xf32>
    %cst_46 = arith.constant 0.000000e+00 : f32
    %70 = vector.broadcast %cst_46 : f32 to vector<8x128xf32>
    %71 = arith.maximumf %67, %70 : vector<8x128xf32>
    %cst_47 = arith.constant 2.000000e-01 : f32
    %72 = vector.broadcast %cst_47 : f32 to vector<8x128xf32>
    %73 = arith.mulf %72, %71 : vector<8x128xf32>
    %74 = arith.addf %69, %73 : vector<8x128xf32>
    %c4_i32 = arith.constant 4 : i32
    %75 = arith.index_cast %c4_i32 : i32 to index
    %c0_48 = arith.constant 0 : index
    %c0_49 = arith.constant 0 : index
    %76 = vector.load %arg6[%75, %c0_48, %c0_49] : memref<8x8x128xf32, #tpu.memory_space<vmem>>, vector<1x8x128xf32>
    %77 = vector.shape_cast %76 : vector<1x8x128xf32> to vector<8x128xf32>
    %78 = vector.shape_cast %74 : vector<8x128xf32> to vector<1x8x128xf32>
    tpu.vector_store %arg6[%75, %c0_48, %c0_49], %78 {strides = array<i32>} : memref<8x8x128xf32, #tpu.memory_space<vmem>>, vector<1x8x128xf32>,
    %cst_50 = arith.constant dense<0.000000e+00> : vector<8x128xf32>
    %79 = tpu.matmul %74, %9, %cst_50 {dimension_numbers = #tpu.dot_dimension_numbers<[1], [0], [0], [1], [0, 0, 1, 1], [], []>} : vector<8x128xf32>, vector<128x128xf32>, vector<8x128xf32> -> vector<8x128xf32>
    %80 = arith.index_cast %c4_i32 : i32 to index
    %c0_51 = arith.constant 0 : index
    %c0_52 = arith.constant 0 : index
    %81 = vector.load %arg8[%80, %c0_51, %c0_52] : memref<8x8x128xf32, #tpu.memory_space<vmem>>, vector<1x8x128xf32>
    %82 = vector.shape_cast %81 : vector<1x8x128xf32> to vector<8x128xf32>
    %83 = arith.addf %79, %82 : vector<8x128xf32>
    %cst_53 = arith.constant 8.000000e-01 : f32
    %84 = vector.broadcast %cst_53 : f32 to vector<8x128xf32>
    %85 = arith.mulf %84, %74 : vector<8x128xf32>
    %cst_54 = arith.constant 0.000000e+00 : f32
    %86 = vector.broadcast %cst_54 : f32 to vector<8x128xf32>
    %87 = arith.maximumf %83, %86 : vector<8x128xf32>
    %cst_55 = arith.constant 2.000000e-01 : f32
    %88 = vector.broadcast %cst_55 : f32 to vector<8x128xf32>
    %89 = arith.mulf %88, %87 : vector<8x128xf32>
    %90 = arith.addf %85, %89 : vector<8x128xf32>
    %c5_i32 = arith.constant 5 : i32
    %91 = arith.index_cast %c5_i32 : i32 to index
    %c0_56 = arith.constant 0 : index
    %c0_57 = arith.constant 0 : index
    %92 = vector.load %arg6[%91, %c0_56, %c0_57] : memref<8x8x128xf32, #tpu.memory_space<vmem>>, vector<1x8x128xf32>
    %93 = vector.shape_cast %92 : vector<1x8x128xf32> to vector<8x128xf32>
    %94 = vector.shape_cast %90 : vector<8x128xf32> to vector<1x8x128xf32>
    tpu.vector_store %arg6[%91, %c0_56, %c0_57], %94 {strides = array<i32>} : memref<8x8x128xf32, #tpu.memory_space<vmem>>, vector<1x8x128xf32>,
    %cst_58 = arith.constant dense<0.000000e+00> : vector<8x128xf32>
    %95 = tpu.matmul %90, %9, %cst_58 {dimension_numbers = #tpu.dot_dimension_numbers<[1], [0], [0], [1], [0, 0, 1, 1], [], []>} : vector<8x128xf32>, vector<128x128xf32>, vector<8x128xf32> -> vector<8x128xf32>
    %96 = arith.index_cast %c5_i32 : i32 to index
    %c0_59 = arith.constant 0 : index
    %c0_60 = arith.constant 0 : index
    %97 = vector.load %arg8[%96, %c0_59, %c0_60] : memref<8x8x128xf32, #tpu.memory_space<vmem>>, vector<1x8x128xf32>
    %98 = vector.shape_cast %97 : vector<1x8x128xf32> to vector<8x128xf32>
    %99 = arith.addf %95, %98 : vector<8x128xf32>
    %cst_61 = arith.constant 8.000000e-01 : f32
    %100 = vector.broadcast %cst_61 : f32 to vector<8x128xf32>
    %101 = arith.mulf %100, %90 : vector<8x128xf32>
    %cst_62 = arith.constant 0.000000e+00 : f32
    %102 = vector.broadcast %cst_62 : f32 to vector<8x128xf32>
    %103 = arith.maximumf %99, %102 : vector<8x128xf32>
    %cst_63 = arith.constant 2.000000e-01 : f32
    %104 = vector.broadcast %cst_63 : f32 to vector<8x128xf32>
    %105 = arith.mulf %104, %103 : vector<8x128xf32>
    %106 = arith.addf %101, %105 : vector<8x128xf32>
    %c6_i32 = arith.constant 6 : i32
    %107 = arith.index_cast %c6_i32 : i32 to index
    %c0_64 = arith.constant 0 : index
    %c0_65 = arith.constant 0 : index
    %108 = vector.load %arg6[%107, %c0_64, %c0_65] : memref<8x8x128xf32, #tpu.memory_space<vmem>>, vector<1x8x128xf32>
    %109 = vector.shape_cast %108 : vector<1x8x128xf32> to vector<8x128xf32>
    %110 = vector.shape_cast %106 : vector<8x128xf32> to vector<1x8x128xf32>
    tpu.vector_store %arg6[%107, %c0_64, %c0_65], %110 {strides = array<i32>} : memref<8x8x128xf32, #tpu.memory_space<vmem>>, vector<1x8x128xf32>,
    %cst_66 = arith.constant dense<0.000000e+00> : vector<8x128xf32>
    %111 = tpu.matmul %106, %9, %cst_66 {dimension_numbers = #tpu.dot_dimension_numbers<[1], [0], [0], [1], [0, 0, 1, 1], [], []>} : vector<8x128xf32>, vector<128x128xf32>, vector<8x128xf32> -> vector<8x128xf32>
    %112 = arith.index_cast %c6_i32 : i32 to index
    %c0_67 = arith.constant 0 : index
    %c0_68 = arith.constant 0 : index
    %113 = vector.load %arg8[%112, %c0_67, %c0_68] : memref<8x8x128xf32, #tpu.memory_space<vmem>>, vector<1x8x128xf32>
    %114 = vector.shape_cast %113 : vector<1x8x128xf32> to vector<8x128xf32>
    %115 = arith.addf %111, %114 : vector<8x128xf32>
    %cst_69 = arith.constant 8.000000e-01 : f32
    %116 = vector.broadcast %cst_69 : f32 to vector<8x128xf32>
    %117 = arith.mulf %116, %106 : vector<8x128xf32>
    %cst_70 = arith.constant 0.000000e+00 : f32
    %118 = vector.broadcast %cst_70 : f32 to vector<8x128xf32>
    %119 = arith.maximumf %115, %118 : vector<8x128xf32>
    %cst_71 = arith.constant 2.000000e-01 : f32
    %120 = vector.broadcast %cst_71 : f32 to vector<8x128xf32>
    %121 = arith.mulf %120, %119 : vector<8x128xf32>
    %122 = arith.addf %117, %121 : vector<8x128xf32>
    %c7_i32 = arith.constant 7 : i32
    %123 = arith.index_cast %c7_i32 : i32 to index
    %c0_72 = arith.constant 0 : index
    %c0_73 = arith.constant 0 : index
    %124 = vector.load %arg6[%123, %c0_72, %c0_73] : memref<8x8x128xf32, #tpu.memory_space<vmem>>, vector<1x8x128xf32>
    %125 = vector.shape_cast %124 : vector<1x8x128xf32> to vector<8x128xf32>
    %126 = vector.shape_cast %122 : vector<8x128xf32> to vector<1x8x128xf32>
    tpu.vector_store %arg6[%123, %c0_72, %c0_73], %126 {strides = array<i32>} : memref<8x8x128xf32, #tpu.memory_space<vmem>>, vector<1x8x128xf32>,
    %cst_74 = arith.constant dense<0.000000e+00> : vector<8x128xf32>
    %127 = tpu.matmul %122, %9, %cst_74 {dimension_numbers = #tpu.dot_dimension_numbers<[1], [0], [0], [1], [0, 0, 1, 1], [], []>} : vector<8x128xf32>, vector<128x128xf32>, vector<8x128xf32> -> vector<8x128xf32>
    %128 = arith.index_cast %c7_i32 : i32 to index
    %c0_75 = arith.constant 0 : index
    %c0_76 = arith.constant 0 : index
    %129 = vector.load %arg8[%128, %c0_75, %c0_76] : memref<8x8x128xf32, #tpu.memory_space<vmem>>, vector<1x8x128xf32>
    %130 = vector.shape_cast %129 : vector<1x8x128xf32> to vector<8x128xf32>
    %131 = arith.addf %127, %130 : vector<8x128xf32>
    %cst_77 = arith.constant 8.000000e-01 : f32
    %132 = vector.broadcast %cst_77 : f32 to vector<8x128xf32>
    %133 = arith.mulf %132, %122 : vector<8x128xf32>
    %cst_78 = arith.constant 0.000000e+00 : f32
    %134 = vector.broadcast %cst_78 : f32 to vector<8x128xf32>
    %135 = arith.maximumf %131, %134 : vector<8x128xf32>
    %cst_79 = arith.constant 2.000000e-01 : f32
    %136 = vector.broadcast %cst_79 : f32 to vector<8x128xf32>
    %137 = arith.mulf %136, %135 : vector<8x128xf32>
    %138 = arith.addf %133, %137 : vector<8x128xf32>
    %c8_i32 = arith.constant 8 : i32
    %c0_80 = arith.constant 0 : index
    %c0_81 = arith.constant 0 : index
    %139 = vector.load %arg7[%c0_80, %c0_81] : memref<8x128xf32, #tpu.memory_space<vmem>>, vector<8x128xf32>
    tpu.vector_store %arg7[%c0_80, %c0_81], %138 {strides = array<i32>} : memref<8x128xf32, #tpu.memory_space<vmem>>, vector<8x128xf32>,
    return
  }
  func.func @transform_0(%arg0: i32, %arg1: i32) -> (i32, i32, i32) {
    %c0_i32 = arith.constant 0 : i32
    %c0_i32_0 = arith.constant 0 : i32
    return %arg1, %arg0, %c0_i32 : i32, i32, i32
  }
  func.func @transform_1(%arg0: i32, %arg1: i32) -> (i32, i32, i32) {
    %c0_i32 = arith.constant 0 : i32
    %c0_i32_0 = arith.constant 0 : i32
    return %arg1, %arg0, %c0_i32 : i32, i32, i32
  }
  func.func @transform_2(%arg0: i32, %arg1: i32) -> (i32, i32) {
    %c0_i32 = arith.constant 0 : i32
    %c0_i32_0 = arith.constant 0 : i32
    %c0_i32_1 = arith.constant 0 : i32
    return %c0_i32, %c0_i32_0 : i32, i32
  }
  func.func @transform_3(%arg0: i32, %arg1: i32) -> (i32, i32) {
    %c0_i32 = arith.constant 0 : i32
    %c0_i32_0 = arith.constant 0 : i32
    %c0_i32_1 = arith.constant 0 : i32
    return %c0_i32, %c0_i32_0 : i32, i32
  }
  func.func @transform_4(%arg0: i32, %arg1: i32) -> (i32, i32, i32) {
    %c0_i32 = arith.constant 0 : i32
    %c0_i32_0 = arith.constant 0 : i32
    return %arg1, %arg0, %c0_i32 : i32, i32, i32
  }
}

</mosaic_0001>

<bundles_post_ra>
// kernel: rnn_forward.1
= control target key start
LH: loop header
LB: loop body
LE: loop exit
PB: predicated region body
PF: predicated region fallthrough
CT: control target
= control target key end

     0   :  { %v1282_v0 = vmov 0.0   ;;  %vm1283_vm0 = vmmov 0   ;;  %vm64_vm1 = vcmask 1045504   ;;  %vm39_vm2 = vcmask 48128   ;;  %s1755_s2 = inlined_call_operand.vmem [shape: f32[128,128], index: 2, kind: input, shape index: {}]   ;;  %s1756_s3 = inlined_call_operand.vmem [shape: f32[6,128], index: 3, kind: input, shape index: {}]   ;;  %s1757_s0 = inlined_call_operand.vmem [shape: f32[8,8,6], index: 0, kind: input, shape index: {}]   ;;  %s1758_s4 = inlined_call_operand.vmem [shape: f32[8,8,128], index: 4, kind: output, shape index: {}]   ;;  %s1759_s1 = inlined_call_operand.vmem [shape: f32[8,8,128], index: 1, kind: input, shape index: {}]  }
   0x1   :  { %1000 = vmatprep.subr.mxu1 %v1282_v0  ;;  %v1313_v1 = vld [vmem:[%s1755_s2 + $0x78] sm:$0xff]  ;;  %v1318_v2 = vld [vmem:[%s1755_s2 + $0x70] sm:$0xff]  ;;  %1032 = vmatprep.mubr.msk.f32.mxu1 %vm1283_vm0, %v1282_v0  ;;  %v1327_v3 = vld [vmem:[%s1755_s2 + $0x68] sm:$0xff]  ;;  %198 = vst [vmem:[%s1758_s4] sm:$0xff] %v1282_v0 }
   0x2   :  { %1001 = vmatpush3.msra.mxu1 %v1313_v1  ;;  %v1334_v4 = vld [vmem:[%s1755_s2 + $0x60] sm:$0xff]  ;;  %v23_v7 = vld [vmem:[%s1757_s0 + $0x8] sm:$0xff]  ;;  %v1350_v8 = vld [vmem:[%s1755_s2 + $0x58] sm:$0xff] }
   0x3   :  { %1002 = vmatprep.subr.mxu1 %v1282_v0  ;;  %v30_v5 = vld [vmem:[%s1756_s3] sm:$0x3f]  ;;  %v1358_v9 = vld [vmem:[%s1755_s2 + $0x50] sm:$0xff]  ;;  %v1367_v10 = vld [vmem:[%s1755_s2 + $0x48] sm:$0xff] }
   0x4   :  { %1003 = vmatpush3.msra.mxu1 %v1318_v2  ;;  %v22_v6 = vld [vmem:[%s1757_s0] sm:$0xff]  ;;  %986 = vmatprep.subr.msk.mxu0 %vm64_vm1, %v30_v5  ;;  %v1385_v12 = vld [vmem:[%s1755_s2 + $0x38] sm:$0xff]  ;;  %v1394_v13 = vld [vmem:[%s1755_s2 + $0x30] sm:$0xff] }
   0x5   :  { %1004 = vmatprep.subr.mxu1 %v1282_v0  ;;  %987 = vmatpush3.msk.msra.mxu0 %vm64_vm1, %v30_v5  ;;  %v1376_v11 = vld [vmem:[%s1755_s2 + $0x40] sm:$0xff]  ;;  %v1403_v14 = vld [vmem:[%s1755_s2 + $0x28] sm:$0xff]  ;;  %v1421_v16 = vld [vmem:[%s1755_s2 + $0x18] sm:$0xff] }
   0x6   :  { %1005 = vmatpush3.msra.mxu1 %v1327_v3  ;;  %988 = vmatprep.mubr.msk.f32.mxu0 %vm39_vm2, %v22_v6  ;;  %v1412_v15 = vld [vmem:[%s1755_s2 + $0x20] sm:$0xff]  ;;  %v24_v17 = vld [vmem:[%s1757_s0 + $0x10] sm:$0xff]  ;;  %v25_v19 = vld [vmem:[%s1757_s0 + $0x18] sm:$0xff] }
   0x7   :  { %1006 = vmatprep.subr.mxu1 %v1282_v0  ;;  %989 = vmatmul.mubr.msk.f32.vlgmr.msra.gmra.mxu0 %vm39_vm2, %v23_v7  ;;  %v1433_v18 = vld [vmem:[%s1755_s2 + $0x10] sm:$0xff]  ;;  %v1445_v20 = vld [vmem:[%s1755_s2 + $0x8] sm:$0xff]  ;;  %v1454_v21 = vld [vmem:[%s1755_s2] sm:$0xff] }
   0x8   :  { %1007 = vmatpush3.msra.mxu1 %v1334_v4  ;;  %1035 = vmatprep.subr.mxu0 %v1282_v0  ;;  %v26_v22 = vld [vmem:[%s1757_s0 + $0x20] sm:$0xff]  ;;  %v27_v23 = vld [vmem:[%s1757_s0 + $0x28] sm:$0xff]  ;;  %v28_v24 = vld [vmem:[%s1757_s0 + $0x30] sm:$0xff] }
   0x9   :  { %1008 = vmatprep.subr.mxu1 %v1282_v0  ;;  %1036 = vmatpush3.msra.mxu0 %v1313_v1  ;;  %v29_v25 = vld [vmem:[%s1757_s0 + $0x38] sm:$0xff]  ;;  %v31_v28 = vld [vmem:[%s1759_s1] sm:$0xff]  ;;  %v32_v40 = vld [vmem:[%s1759_s1 + $0x8] sm:$0xff] }
   0xa   :  { %1009 = vmatpush3.msra.mxu1 %v1350_v8  ;;  %1037 = vmatprep.subr.mxu0 %v1282_v0  ;;  %v33_v50 = vld [vmem:[%s1759_s1 + $0x10] sm:$0xff]  ;;  %v34_v59 = vld [vmem:[%s1759_s1 + $0x18] sm:$0xff] }
   0xb   :  { %1010 = vmatprep.subr.mxu1 %v1282_v0  ;;  %1038 = vmatpush3.msra.mxu0 %v1318_v2 }
   0xc   :  { %1011 = vmatpush3.msra.mxu1 %v1358_v9  ;;  %1039 = vmatprep.subr.mxu0 %v1282_v0 }
   0xd   :  { %1012 = vmatprep.subr.mxu1 %v1282_v0  ;;  %1040 = vmatpush3.msra.mxu0 %v1327_v3 }
   0xe   :  { %1013 = vmatpush3.msra.mxu1 %v1367_v10  ;;  %1041 = vmatprep.subr.mxu0 %v1282_v0 }
   0xf   :  { %1014 = vmatprep.subr.mxu1 %v1282_v0  ;;  %1042 = vmatpush3.msra.mxu0 %v1334_v4 }
  0x10   :  { %1015 = vmatpush3.msra.mxu1 %v1376_v11  ;;  %1043 = vmatprep.subr.mxu0 %v1282_v0 }
  0x11   :  { %1016 = vmatprep.subr.mxu1 %v1282_v0  ;;  %1044 = vmatpush3.msra.mxu0 %v1350_v8 }
  0x12   :  { %1017 = vmatpush3.msra.mxu1 %v1385_v12  ;;  %1045 = vmatprep.subr.mxu0 %v1282_v0 }
  0x13   :  { %1018 = vmatprep.subr.mxu1 %v1282_v0  ;;  %1046 = vmatpush3.msra.mxu0 %v1358_v9 }
  0x14   :  { %1019 = vmatpush3.msra.mxu1 %v1394_v13  ;;  %1047 = vmatprep.subr.mxu0 %v1282_v0 }
  0x15   :  { %1020 = vmatprep.subr.mxu1 %v1282_v0  ;;  %1048 = vmatpush3.msra.mxu0 %v1367_v10 }
  0x16   :  { %1021 = vmatpush3.msra.mxu1 %v1403_v14  ;;  %1049 = vmatprep.subr.mxu0 %v1282_v0 }
  0x17   :  { %1022 = vmatprep.subr.mxu1 %v1282_v0  ;;  %1050 = vmatpush3.msra.mxu0 %v1376_v11 }
  0x18   :  { %1023 = vmatpush3.msra.mxu1 %v1412_v15  ;;  %1051 = vmatprep.subr.mxu0 %v1282_v0 }
  0x19   :  { %1024 = vmatprep.subr.mxu1 %v1282_v0  ;;  %991 = vmatprep.mubr.msk.f32.mxu0 %vm39_vm2, %v24_v17 }
  0x1a   :  { %1025 = vmatpush3.msra.mxu1 %v1421_v16  ;;  %1052 = vmatpush3.msra.mxu0 %v1385_v12 }
  0x1b   :  { %1026 = vmatprep.subr.mxu1 %v1282_v0  ;;  %992 = vmatmul.mubr.msk.f32.gmra.mxu0 %vm39_vm2, %v25_v19  ;;  %v35_v19 = vld [vmem:[%s1759_s1 + $0x20] sm:$0xff] }
  0x1c   :  { %1027 = vmatpush3.msra.mxu1 %v1433_v18  ;;  %1053 = vmatprep.subr.mxu0 %v1282_v0 }
  0x1d   :  { %1028 = vmatprep.subr.mxu1 %v1282_v0  ;;  %1054 = vmatpush3.msra.mxu0 %v1394_v13 }
  0x1e   :  { %1029 = vmatpush3.msra.mxu1 %v1445_v20  ;;  %1055 = vmatprep.subr.mxu0 %v1282_v0 }
  0x1f   :  { %1030 = vmatprep.subr.mxu1 %v1282_v0  ;;  %1056 = vmatpush3.msra.mxu0 %v1403_v14 }
  0x20   :  { %1031 = vmatpush3.msra.mxu1 %v1454_v21  ;;  %1057 = vmatprep.subr.mxu0 %v1282_v0 }
  0x21   :  { %1033 = vmatmul.mubr.f32.vlgmr.msra.gmra.mxu1 %v1282_v0  ;;  %1070 = vmatprep.subr.mxu1 %v1282_v0 }
  0x22   :  { %1058 = vmatpush3.msra.mxu0 %v1412_v15  ;;  %1071 = vmatpush3.msra.mxu1 %v1313_v1 }
  0x23   :  { %1059 = vmatprep.subr.mxu0 %v1282_v0  ;;  %1072 = vmatprep.subr.mxu1 %v1282_v0 }
  0x24   :  { %1060 = vmatpush3.msra.mxu0 %v1421_v16  ;;  %1073 = vmatpush3.msra.mxu1 %v1318_v2 }
  0x25   :  { %1061 = vmatprep.subr.mxu0 %v1282_v0  ;;  %1074 = vmatprep.subr.mxu1 %v1282_v0 }
  0x26   :  { %1062 = vmatpush3.msra.mxu0 %v1433_v18  ;;  %1075 = vmatpush3.msra.mxu1 %v1327_v3 }
  0x27   :  { %1063 = vmatprep.subr.mxu0 %v1282_v0  ;;  %1076 = vmatprep.subr.mxu1 %v1282_v0 }
  0x28   :  { %1064 = vmatpush3.msra.mxu0 %v1445_v20  ;;  %1077 = vmatpush3.msra.mxu1 %v1334_v4 }
  0x29   :  { %1065 = vmatprep.subr.mxu0 %v1282_v0  ;;  %1078 = vmatprep.subr.mxu1 %v1282_v0 }
  0x2a   :  { %1066 = vmatpush3.msra.mxu0 %v1454_v21  ;;  %1079 = vmatpush3.msra.mxu1 %v1350_v8 }
  0x2b   :  { %1080 = vmatprep.subr.mxu1 %v1282_v0  ;;  %1102 = vmatprep.mubr.msk.f32.mxu1 %vm1283_vm0, %v1282_v0 }
  0x2c   :  { %1081 = vmatpush3.msra.mxu1 %v1358_v9  ;;  %1105 = vmatprep.subr.mxu0 %v1282_v0 }
  0x2d   :  { %1082 = vmatprep.subr.mxu1 %v1282_v0  ;;  %994 = vmatprep.mubr.msk.f32.mxu0 %vm39_vm2, %v26_v22 }
  0x2e   :  { %1083 = vmatpush3.msra.mxu1 %v1367_v10  ;;  %995 = vmatmul.mubr.msk.f32.gmra.mxu0 %vm39_vm2, %v27_v23 }
  0x2f   :  { %1084 = vmatprep.subr.mxu1 %v1282_v0  ;;  %997 = vmatprep.mubr.msk.f32.mxu0 %vm39_vm2, %v28_v24 }
  0x30   :  { %1085 = vmatpush3.msra.mxu1 %v1376_v11 }
  0x31   :  { %1086 = vmatprep.subr.mxu1 %v1282_v0 }
  0x32   :  { %1087 = vmatpush3.msra.mxu1 %v1385_v12  ;;  %998 = vmatmul.mubr.msk.f32.gmra.mxu0 %vm39_vm2, %v29_v25 }
  0x33   :  { %1088 = vmatprep.subr.mxu1 %v1282_v0  ;;  %1067 = vmatprep.mubr.msk.f32.mxu0 %vm1283_vm0, %v1282_v0 }
  0x34   :  { %1089 = vmatpush3.msra.mxu1 %v1394_v13 }
  0x35   :  { %1090 = vmatprep.subr.mxu1 %v1282_v0 }
  0x36   :  { %1091 = vmatpush3.msra.mxu1 %v1403_v14 }
  0x37   :  { %1092 = vmatprep.subr.mxu1 %v1282_v0 }
  0x38   :  { %1093 = vmatpush3.msra.mxu1 %v1412_v15 }
  0x39   :  { %1094 = vmatprep.subr.mxu1 %v1282_v0 }
  0x3a   :  { %1095 = vmatpush3.msra.mxu1 %v1421_v16 }
  0x3b   :  { %1096 = vmatprep.subr.mxu1 %v1282_v0 }
  0x3c   :  { %1097 = vmatpush3.msra.mxu1 %v1433_v18 }
  0x3d   :  { %1098 = vmatprep.subr.mxu1 %v1282_v0 }
  0x3e   :  { %1099 = vmatpush3.msra.mxu1 %v1445_v20 }
  0x3f   :  { %1100 = vmatprep.subr.mxu1 %v1282_v0 }
  0x40   :  { %1101 = vmatpush3.msra.mxu1 %v1454_v21 }
  0x41   :  { %1140 = vmatprep.subr.mxu1 %v1282_v0 }
  0xc7   :  { %v990_v26 = vpop.f32.mrf.mxu0 }
  0xc8   :  { %v140_v42 = vadd.f32 %v990_v26, %v32_v40 }
  0xc9   :  { %v134_v27 = vpop.f32.mrf.mxu0 }
  0xca   :  { %v135_v29 = vadd.f32 %v134_v27, %v31_v28 }
  0xdb   :  { %v1573_v35 = vpop.f32.mrf.mxu0 }
  0xdc   :  { %v150_v60 = vadd.f32 %v1573_v35, %v34_v59 }
  0xdd   :  { %v144_v36 = vpop.f32.mrf.mxu0 }
  0xde   :  { %v145_v51 = vadd.f32 %v144_v36, %v33_v50 }
  0xe1   :  { %v266_v30 = vpop.f32.mrf.mxu1 }
  0xe2   :  { %v267_v31 = vadd.f32 %v266_v30, %v135_v29 }
  0xe3   :  { %v1034_v32 = vpop.f32.mrf.mxu1 }
  0xe4   :  { %v271_v33 = vmax.f32 %v267_v31, 0.0 }
  0xe6   :  { %v272_v34 = vmul.f32 0.2, %v271_v33 }
  0xe8   :  { %834 = vst [vmem:[%s1758_s4 + $0x8] sm:$0xff] %v272_v34  ;;  %1068 = vmatmul.mubr.f32.vlgmr.msra.gmra.mxu0 %v272_v34  ;;  %v348_v47 = vmul.f32 0.8, %v272_v34 }
  0xe9   :  { %1106 = vmatpush3.msra.mxu0 %v1313_v1  ;;  %1137 = vmatprep.mubr.msk.f32.mxu0 %vm1283_vm0, %v1282_v0 }
  0xea   :  { %1107 = vmatprep.subr.mxu0 %v1282_v0 }
  0xeb   :  { %1108 = vmatpush3.msra.mxu0 %v1318_v2 }
  0xec   :  { %1109 = vmatprep.subr.mxu0 %v1282_v0 }
  0xed   :  { %1110 = vmatpush3.msra.mxu0 %v1327_v3 }
  0xee   :  { %1111 = vmatprep.subr.mxu0 %v1282_v0  ;;  %v1575_v37 = vpop.f32.mrf.mxu0 }
  0xef   :  { %1112 = vmatpush3.msra.mxu0 %v1334_v4 }
  0xf0   :  { %1113 = vmatprep.subr.mxu0 %v1282_v0  ;;  %v1577_v38 = vpop.f32.mrf.mxu0 }
  0xf1   :  { %1114 = vmatpush3.msra.mxu0 %v1350_v8  ;;  %v155_v22 = vadd.f32 %v1577_v38, %v35_v19 }
  0xf2   :  { %1115 = vmatprep.subr.mxu0 %v1282_v0  ;;  %v999_v39 = vpop.f32.mrf.mxu0 }
  0xf3   :  { %1116 = vmatpush3.msra.mxu0 %v1358_v9 }
  0xf4   :  { %1117 = vmatprep.subr.mxu0 %v1282_v0  ;;  %v1582_v41 = vpop.f32.mrf.mxu0 }
  0xf5   :  { %1118 = vmatpush3.msra.mxu0 %v1367_v10 }
  0xf6   :  { %1119 = vmatprep.subr.mxu0 %v1282_v0 }
  0xf7   :  { %1120 = vmatpush3.msra.mxu0 %v1376_v11 }
  0xf8   :  { %1121 = vmatprep.subr.mxu0 %v1282_v0 }
  0xf9   :  { %1122 = vmatpush3.msra.mxu0 %v1385_v12 }
  0xfa   :  { %1123 = vmatprep.subr.mxu0 %v1282_v0 }
  0xfb   :  { %1124 = vmatpush3.msra.mxu0 %v1394_v13 }
  0xfc   :  { %1125 = vmatprep.subr.mxu0 %v1282_v0 }
  0xfd   :  { %1126 = vmatpush3.msra.mxu0 %v1403_v14 }
  0xfe   :  { %1127 = vmatprep.subr.mxu0 %v1282_v0 }
  0xff   :  { %1128 = vmatpush3.msra.mxu0 %v1412_v15 }
 0x100   :  { %1129 = vmatprep.subr.mxu0 %v1282_v0 }
 0x101   :  { %1130 = vmatpush3.msra.mxu0 %v1421_v16 }
 0x102   :  { %1131 = vmatprep.subr.mxu0 %v1282_v0 }
 0x103   :  { %1132 = vmatpush3.msra.mxu0 %v1433_v18 }
 0x104   :  { %1133 = vmatprep.subr.mxu0 %v1282_v0 }
 0x105   :  { %1134 = vmatpush3.msra.mxu0 %v1445_v20 }
 0x106   :  { %1135 = vmatprep.subr.mxu0 %v1282_v0 }
 0x107   :  { %1136 = vmatpush3.msra.mxu0 %v1454_v21 }
 0x108   :  { %1175 = vmatprep.subr.mxu0 %v1282_v0 }
 0x1a8   :  { %v344_v43 = vpop.f32.mrf.mxu0 }
 0x1a9   :  { %v345_v44 = vadd.f32 %v344_v43, %v140_v42 }
 0x1aa   :  { %v1069_v45 = vpop.f32.mrf.mxu0 }
 0x1ab   :  { %v349_v46 = vmax.f32 %v345_v44, 0.0 }
 0x1ad   :  { %v350_v48 = vmul.f32 0.2, %v349_v46 }
 0x1af   :  { %v351_v49 = vadd.f32 %v350_v48, %v348_v47 }
 0x1b1   :  { %835 = vst [vmem:[%s1758_s4 + $0x10] sm:$0xff] %v351_v49  ;;  %1103 = vmatmul.mubr.f32.vlgmr.msra.gmra.mxu1 %v351_v49  ;;  %v426_v56 = vmul.f32 0.8, %v351_v49 }
 0x1b2   :  { %1141 = vmatpush3.msra.mxu1 %v1313_v1  ;;  %1172 = vmatprep.mubr.msk.f32.mxu1 %vm1283_vm0, %v1282_v0 }
 0x1b3   :  { %1142 = vmatprep.subr.mxu1 %v1282_v0 }
 0x1b4   :  { %1143 = vmatpush3.msra.mxu1 %v1318_v2 }
 0x1b5   :  { %1144 = vmatprep.subr.mxu1 %v1282_v0 }
 0x1b6   :  { %1145 = vmatpush3.msra.mxu1 %v1327_v3 }
 0x1b7   :  { %1146 = vmatprep.subr.mxu1 %v1282_v0 }
 0x1b8   :  { %1147 = vmatpush3.msra.mxu1 %v1334_v4 }
 0x1b9   :  { %1148 = vmatprep.subr.mxu1 %v1282_v0 }
 0x1ba   :  { %1149 = vmatpush3.msra.mxu1 %v1350_v8 }
 0x1bb   :  { %1150 = vmatprep.subr.mxu1 %v1282_v0 }
 0x1bc   :  { %1151 = vmatpush3.msra.mxu1 %v1358_v9 }
 0x1bd   :  { %1152 = vmatprep.subr.mxu1 %v1282_v0 }
 0x1be   :  { %1153 = vmatpush3.msra.mxu1 %v1367_v10 }
 0x1bf   :  { %1154 = vmatprep.subr.mxu1 %v1282_v0 }
 0x1c0   :  { %1155 = vmatpush3.msra.mxu1 %v1376_v11 }
 0x1c1   :  { %1156 = vmatprep.subr.mxu1 %v1282_v0 }
 0x1c2   :  { %1157 = vmatpush3.msra.mxu1 %v1385_v12 }
 0x1c3   :  { %1158 = vmatprep.subr.mxu1 %v1282_v0 }
 0x1c4   :  { %1159 = vmatpush3.msra.mxu1 %v1394_v13 }
 0x1c5   :  { %1160 = vmatprep.subr.mxu1 %v1282_v0 }
 0x1c6   :  { %1161 = vmatpush3.msra.mxu1 %v1403_v14 }
 0x1c7   :  { %1162 = vmatprep.subr.mxu1 %v1282_v0 }
 0x1c8   :  { %1163 = vmatpush3.msra.mxu1 %v1412_v15 }
 0x1c9   :  { %1164 = vmatprep.subr.mxu1 %v1282_v0 }
 0x1ca   :  { %1165 = vmatpush3.msra.mxu1 %v1421_v16 }
 0x1cb   :  { %1166 = vmatprep.subr.mxu1 %v1282_v0 }
 0x1cc   :  { %1167 = vmatpush3.msra.mxu1 %v1433_v18 }
 0x1cd   :  { %1168 = vmatprep.subr.mxu1 %v1282_v0 }
 0x1ce   :  { %1169 = vmatpush3.msra.mxu1 %v1445_v20 }
 0x1cf   :  { %1170 = vmatprep.subr.mxu1 %v1282_v0 }
 0x1d0   :  { %1171 = vmatpush3.msra.mxu1 %v1454_v21 }
 0x1d1   :  { %1210 = vmatprep.subr.mxu1 %v1282_v0 }
 0x271   :  { %v422_v52 = vpop.f32.mrf.mxu1 }
 0x272   :  { %v423_v53 = vadd.f32 %v422_v52, %v145_v51 }
 0x273   :  { %v1104_v54 = vpop.f32.mrf.mxu1 }
 0x274   :  { %v427_v55 = vmax.f32 %v423_v53, 0.0 }
 0x276   :  { %v428_v57 = vmul.f32 0.2, %v427_v55 }
 0x278   :  { %v429_v58 = vadd.f32 %v428_v57, %v426_v56 }
 0x27a   :  { %836 = vst [vmem:[%s1758_s4 + $0x18] sm:$0xff] %v429_v58  ;;  %1138 = vmatmul.mubr.f32.vlgmr.msra.gmra.mxu0 %v429_v58  ;;  %v504_v6 = vmul.f32 0.8, %v429_v58 }
 0x27b   :  { %1176 = vmatpush3.msra.mxu0 %v1313_v1  ;;  %1207 = vmatprep.mubr.msk.f32.mxu0 %vm1283_vm0, %v1282_v0 }
 0x27c   :  { %1177 = vmatprep.subr.mxu0 %v1282_v0 }
 0x27d   :  { %1178 = vmatpush3.msra.mxu0 %v1318_v2 }
 0x27e   :  { %1179 = vmatprep.subr.mxu0 %v1282_v0 }
 0x27f   :  { %1180 = vmatpush3.msra.mxu0 %v1327_v3 }
 0x280   :  { %1181 = vmatprep.subr.mxu0 %v1282_v0 }
 0x281   :  { %1182 = vmatpush3.msra.mxu0 %v1334_v4 }
 0x282   :  { %1183 = vmatprep.subr.mxu0 %v1282_v0 }
 0x283   :  { %1184 = vmatpush3.msra.mxu0 %v1350_v8 }
 0x284   :  { %1185 = vmatprep.subr.mxu0 %v1282_v0 }
 0x285   :  { %1186 = vmatpush3.msra.mxu0 %v1358_v9 }
 0x286   :  { %1187 = vmatprep.subr.mxu0 %v1282_v0 }
 0x287   :  { %1188 = vmatpush3.msra.mxu0 %v1367_v10 }
 0x288   :  { %1189 = vmatprep.subr.mxu0 %v1282_v0 }
 0x289   :  { %1190 = vmatpush3.msra.mxu0 %v1376_v11 }
 0x28a   :  { %1191 = vmatprep.subr.mxu0 %v1282_v0 }
 0x28b   :  { %1192 = vmatpush3.msra.mxu0 %v1385_v12 }
 0x28c   :  { %1193 = vmatprep.subr.mxu0 %v1282_v0 }
 0x28d   :  { %1194 = vmatpush3.msra.mxu0 %v1394_v13 }
 0x28e   :  { %1195 = vmatprep.subr.mxu0 %v1282_v0 }
 0x28f   :  { %1196 = vmatpush3.msra.mxu0 %v1403_v14 }
 0x290   :  { %1197 = vmatprep.subr.mxu0 %v1282_v0 }
 0x291   :  { %1198 = vmatpush3.msra.mxu0 %v1412_v15 }
 0x292   :  { %1199 = vmatprep.subr.mxu0 %v1282_v0 }
 0x293   :  { %1200 = vmatpush3.msra.mxu0 %v1421_v16 }
 0x294   :  { %1201 = vmatprep.subr.mxu0 %v1282_v0 }
 0x295   :  { %1202 = vmatpush3.msra.mxu0 %v1433_v18 }
 0x296   :  { %1203 = vmatprep.subr.mxu0 %v1282_v0 }
 0x297   :  { %1204 = vmatpush3.msra.mxu0 %v1445_v20 }
 0x298   :  { %1205 = vmatprep.subr.mxu0 %v1282_v0 }
 0x299   :  { %1206 = vmatpush3.msra.mxu0 %v1454_v21 }
 0x29a   :  { %1245 = vmatprep.subr.mxu0 %v1282_v0 }
 0x33a   :  { %v500_v61 = vpop.f32.mrf.mxu0 }
 0x33b   :  { %v501_v62 = vadd.f32 %v500_v61, %v150_v60 }
 0x33c   :  { %v1139_v63 = vpop.f32.mrf.mxu0 }
 0x33d   :  { %v505_v5 = vmax.f32 %v501_v62, 0.0 }
 0x33f   :  { %v506_v7 = vmul.f32 0.2, %v505_v5 }
 0x341   :  { %v507_v17 = vadd.f32 %v506_v7, %v504_v6 }
 0x343   :  { %837 = vst [vmem:[%s1758_s4 + $0x20] sm:$0xff] %v507_v17  ;;  %1173 = vmatmul.mubr.f32.vlgmr.msra.gmra.mxu1 %v507_v17  ;;  %v582_v27 = vmul.f32 0.8, %v507_v17 }
 0x344   :  { %1211 = vmatpush3.msra.mxu1 %v1313_v1  ;;  %1242 = vmatprep.mubr.msk.f32.mxu1 %vm1283_vm0, %v1282_v0 }
 0x345   :  { %1212 = vmatprep.subr.mxu1 %v1282_v0 }
 0x346   :  { %1213 = vmatpush3.msra.mxu1 %v1318_v2 }
 0x347   :  { %1214 = vmatprep.subr.mxu1 %v1282_v0 }
 0x348   :  { %1215 = vmatpush3.msra.mxu1 %v1327_v3 }
 0x349   :  { %1216 = vmatprep.subr.mxu1 %v1282_v0 }
 0x34a   :  { %1217 = vmatpush3.msra.mxu1 %v1334_v4 }
 0x34b   :  { %1218 = vmatprep.subr.mxu1 %v1282_v0 }
 0x34c   :  { %1219 = vmatpush3.msra.mxu1 %v1350_v8 }
 0x34d   :  { %1220 = vmatprep.subr.mxu1 %v1282_v0 }
 0x34e   :  { %1221 = vmatpush3.msra.mxu1 %v1358_v9 }
 0x34f   :  { %1222 = vmatprep.subr.mxu1 %v1282_v0 }
 0x350   :  { %1223 = vmatpush3.msra.mxu1 %v1367_v10 }
 0x351   :  { %1224 = vmatprep.subr.mxu1 %v1282_v0 }
 0x352   :  { %1225 = vmatpush3.msra.mxu1 %v1376_v11 }
 0x353   :  { %1226 = vmatprep.subr.mxu1 %v1282_v0 }
 0x354   :  { %1227 = vmatpush3.msra.mxu1 %v1385_v12 }
 0x355   :  { %1228 = vmatprep.subr.mxu1 %v1282_v0 }
 0x356   :  { %1229 = vmatpush3.msra.mxu1 %v1394_v13 }
 0x357   :  { %1230 = vmatprep.subr.mxu1 %v1282_v0 }
 0x358   :  { %1231 = vmatpush3.msra.mxu1 %v1403_v14 }
 0x359   :  { %1232 = vmatprep.subr.mxu1 %v1282_v0 }
 0x35a   :  { %1233 = vmatpush3.msra.mxu1 %v1412_v15 }
 0x35b   :  { %1234 = vmatprep.subr.mxu1 %v1282_v0 }
 0x35c   :  { %1235 = vmatpush3.msra.mxu1 %v1421_v16 }
 0x35d   :  { %1236 = vmatprep.subr.mxu1 %v1282_v0 }
 0x35e   :  { %1237 = vmatpush3.msra.mxu1 %v1433_v18 }
 0x35f   :  { %1238 = vmatprep.subr.mxu1 %v1282_v0 }
 0x360   :  { %1239 = vmatpush3.msra.mxu1 %v1445_v20 }
 0x361   :  { %1240 = vmatprep.subr.mxu1 %v1282_v0 }
 0x362   :  { %1241 = vmatpush3.msra.mxu1 %v1454_v21 }
 0x403   :  { %v578_v23 = vpop.f32.mrf.mxu1 }
 0x404   :  { %v579_v24 = vadd.f32 %v578_v23, %v155_v22 }
 0x405   :  { %v1174_v25 = vpop.f32.mrf.mxu1 }
 0x406   :  { %v583_v26 = vmax.f32 %v579_v24, 0.0 }
 0x408   :  { %v584_v28 = vmul.f32 0.2, %v583_v26 }
 0x40a   :  { %v585_v29 = vadd.f32 %v584_v28, %v582_v27 }
 0x40c   :  { %838 = vst [vmem:[%s1758_s4 + $0x28] sm:$0xff] %v585_v29  ;;  %1208 = vmatmul.mubr.f32.vlgmr.msra.gmra.mxu0 %v585_v29 }
 0x40d   :  { %1246 = vmatpush3.msra.mxu0 %v1313_v1  ;;  %1277 = vmatprep.mubr.msk.f32.mxu0 %vm1283_vm0, %v1282_v0  ;;  %v36_v1 = vld [vmem:[%s1759_s1 + $0x28] sm:$0xff] }
 0x40e   :  { %1247 = vmatprep.subr.mxu0 %v1282_v0 }
 0x40f   :  { %1248 = vmatpush3.msra.mxu0 %v1318_v2  ;;  %v160_v2 = vadd.f32 %v1575_v37, %v36_v1 }
 0x410   :  { %1249 = vmatprep.subr.mxu0 %v1282_v0 }
 0x411   :  { %1250 = vmatpush3.msra.mxu0 %v1327_v3 }
 0x412   :  { %1251 = vmatprep.subr.mxu0 %v1282_v0 }
 0x413   :  { %1252 = vmatpush3.msra.mxu0 %v1334_v4 }
 0x414   :  { %1253 = vmatprep.subr.mxu0 %v1282_v0 }
 0x415   :  { %1254 = vmatpush3.msra.mxu0 %v1350_v8 }
 0x416   :  { %1255 = vmatprep.subr.mxu0 %v1282_v0 }
 0x417   :  { %1256 = vmatpush3.msra.mxu0 %v1358_v9 }
 0x418   :  { %1257 = vmatprep.subr.mxu0 %v1282_v0 }
 0x419   :  { %1258 = vmatpush3.msra.mxu0 %v1367_v10  ;;  %v660_v10 = vmul.f32 0.8, %v585_v29 }
 0x41a   :  { %1259 = vmatprep.subr.mxu0 %v1282_v0 }
 0x41b   :  { %1260 = vmatpush3.msra.mxu0 %v1376_v11 }
 0x41c   :  { %1261 = vmatprep.subr.mxu0 %v1282_v0 }
 0x41d   :  { %1262 = vmatpush3.msra.mxu0 %v1385_v12 }
 0x41e   :  { %1263 = vmatprep.subr.mxu0 %v1282_v0 }
 0x41f   :  { %1264 = vmatpush3.msra.mxu0 %v1394_v13 }
 0x420   :  { %1265 = vmatprep.subr.mxu0 %v1282_v0 }
 0x421   :  { %1266 = vmatpush3.msra.mxu0 %v1403_v14 }
 0x422   :  { %1267 = vmatprep.subr.mxu0 %v1282_v0 }
 0x423   :  { %1268 = vmatpush3.msra.mxu0 %v1412_v15 }
 0x424   :  { %1269 = vmatprep.subr.mxu0 %v1282_v0 }
 0x425   :  { %1270 = vmatpush3.msra.mxu0 %v1421_v16 }
 0x426   :  { %1271 = vmatprep.subr.mxu0 %v1282_v0 }
 0x427   :  { %1272 = vmatpush3.msra.mxu0 %v1433_v18 }
 0x428   :  { %1273 = vmatprep.subr.mxu0 %v1282_v0 }
 0x429   :  { %1274 = vmatpush3.msra.mxu0 %v1445_v20 }
 0x42a   :  { %1275 = vmatprep.subr.mxu0 %v1282_v0  ;;  %v37_v0 = vld [vmem:[%s1759_s1 + $0x30] sm:$0xff] }
 0x42b   :  { %1276 = vmatpush3.msra.mxu0 %v1454_v21  ;;  %v165_v13 = vadd.f32 %v1582_v41, %v37_v0 }
 0x4cc   :  { %v656_v3 = vpop.f32.mrf.mxu0 }
 0x4cd   :  { %v657_v4 = vadd.f32 %v656_v3, %v160_v2 }
 0x4ce   :  { %v1209_v8 = vpop.f32.mrf.mxu0 }
 0x4cf   :  { %v661_v9 = vmax.f32 %v657_v4, 0.0 }
 0x4d1   :  { %v662_v11 = vmul.f32 0.2, %v661_v9 }
 0x4d3   :  { %v663_v12 = vadd.f32 %v662_v11, %v660_v10 }
 0x4d5   :  { %839 = vst [vmem:[%s1758_s4 + $0x30] sm:$0xff] %v663_v12  ;;  %1243 = vmatmul.mubr.f32.vlgmr.msra.gmra.mxu1 %v663_v12  ;;  %v738_v20 = vmul.f32 0.8, %v663_v12 }
 0x595   :  { %v734_v14 = vpop.f32.mrf.mxu1 }
 0x596   :  { %v735_v15 = vadd.f32 %v734_v14, %v165_v13 }
 0x597   :  { %v1244_v16 = vpop.f32.mrf.mxu1 }
 0x598   :  { %v739_v18 = vmax.f32 %v735_v15, 0.0 }
 0x59a   :  { %v740_v21 = vmul.f32 0.2, %v739_v18 }
 0x59c   :  { %v741_v30 = vadd.f32 %v740_v21, %v738_v20 }
 0x59e   :  { %840 = vst [vmem:[%s1758_s4 + $0x38] sm:$0xff] %v741_v30  ;;  %1278 = vmatmul.mubr.f32.vlgmr.msra.gmra.mxu0 %v741_v30 }
 0x65e   :  { %v812_v31 = vpop.f32.mrf.mxu0 }
 0x660   :  { %v1279_v32 = vpop.f32.mrf.mxu0 }

</bundles_post_ra>
